<compile_context>
chip_gen: v6e
topology: v6e:2x2x1
jax: 0.10.0
libtpu: 0.0.40
codegen_flags: <defaults>
</compile_context>

<pallas_src>
import functools

import jax
import jax.numpy as jnp
import numpy as np
from jax.experimental import pallas as pl
from jax.experimental.pallas import tpu as pltpu

# float32 machine epsilon, matching torch.finfo(torch.float).eps
_F32_EPS = float(np.finfo(np.float32).eps)
_LANES = 128


def _qd_kernel(yp_ref, yt_ref, out_ref, acc_ref, *,
               lambda_, alpha_, soften_, batch_size, n_pairs, pad_pairs):
    """Streaming reduction over (tr, 128) tiles of interleaved bounds.

    yp_ref  : (tr, 128)   y_pred, native interleave: even lane = upper bound,
                          odd lane = lower bound of the same interval.
    yt_ref  : (tr, 128)   targets, duplicated into both lanes of each pair.
    out_ref : (1, 1)      final scalar loss (written in the epilogue).
    acc_ref : (3, 8, 128) running vreg-sized sums [k_s, k_h, width*k_h];
                          per-pair values live in odd lanes, even lanes hold
                          harmless garbage removed in the epilogue.
    """
    i = pl.program_id(0)
    tr, lanes = yt_ref.shape

    @pl.when(i == 0)
    def _init():
        acc_ref[...] = jnp.zeros_like(acc_ref)

    p = yp_ref[...].astype(jnp.float32)      # (tr, 128)
    t = yt_ref[...].astype(jnp.float32)      # (tr, 128)

    # Alternating +1/-1 lane sign: even lanes want (y_u - y_t), odd lanes
    # want (y_t - y_l) = -(y_l - y_t).  Negation is exact in fp.
    lane = jax.lax.broadcasted_iota(jnp.int32, (1, lanes), 1)
    sgn = jnp.where((lane & 1) == 0, jnp.float32(1.0), jnp.float32(-1.0))

    d = (p - t) * sgn                        # even: u - t, odd: t - l
    sig = jax.nn.sigmoid(jnp.float32(soften_) * d)   # EUP slot

    # Pair combine via XLU lane rotate: odd lane 2k+1 sees lane 2k's value.
    d_roll = pltpu.roll(d, shift=1, axis=1)
    sig_roll = pltpu.roll(sig, shift=1, axis=1)

    k_s = sig * sig_roll                                     # valid @ odd lanes
    covered = jnp.logical_and(d > 0.0, d_roll > 0.0)         # strict '>' ==
    k_h = covered.astype(jnp.float32)                        # max(0, sign(.))
    w_cov = jnp.where(covered, d + d_roll, jnp.float32(0.0)) # (u-t)+(t-l)

    # Reduce the tile to one vreg per quantity with pure sublane-group adds
    # (VPU only); the single cross-lane (XLU) reduce happens in the epilogue.
    g = tr // 8
    acc_ref[0] += jnp.sum(k_s.reshape(g, 8, lanes), axis=0)
    acc_ref[1] += jnp.sum(k_h.reshape(g, 8, lanes), axis=0)
    acc_ref[2] += jnp.sum(w_cov.reshape(g, 8, lanes), axis=0)

    @pl.when(i == pl.num_programs(0) - 1)
    def _finalize():
        lane8 = jax.lax.broadcasted_iota(jnp.int32, (8, lanes), 1)
        odd = (lane8 & 1) == 1
        zero = jnp.float32(0.0)
        sum_ks = jnp.sum(jnp.where(odd, acc_ref[0], zero))
        sum_kh = jnp.sum(jnp.where(odd, acc_ref[1], zero))
        sum_wc = jnp.sum(jnp.where(odd, acc_ref[2], zero))

        # Zero-padded tail pairs contribute exactly sigmoid(0)^2 = 0.25 each
        # to sum_ks (and exactly 0 to k_h / width*k_h): correct once here.
        sum_ks = sum_ks - jnp.float32(0.25) * jnp.float32(pad_pairs)

        picp_s = sum_ks / jnp.float32(n_pairs)
        mpiw_c = sum_wc / (sum_kh + jnp.float32(_F32_EPS))
        coef = jnp.float32(batch_size / (alpha_ * (1.0 - alpha_)))
        mle_picp = coef * jnp.square(
            jnp.maximum(jnp.float32(0.0),
                        jnp.float32(1.0 - alpha_) - picp_s))
        loss = mpiw_c + jnp.float32(lambda_) * mle_picp
        out_ref[...] = jnp.reshape(loss, (1, 1))


def qd_objective(y_pred, y_true, *, lambda_=0.001, alpha_=0.05,
                 soften_=160.0, batch_size=128, block_rows=2048):
    """JAX/Pallas equivalent of qd_objective.forward.

    y_pred: [B, 2*M] (upper bounds in even columns, lower bounds in odd).
    y_true: [B, M_t] broadcast-compatible with y_pred[:, ::2] (M_t == M or 1).
    Note: `batch_size` mirrors the PyTorch module's constructor attribute; it
    is NOT inferred from the data (same as the reference implementation).
    Returns a shape-(1,) float32 array (matching the torch broadcast shape).
    """
    B, two_m = y_pred.shape
    assert two_m % 2 == 0, "y_pred must have an even number of columns"
    assert block_rows % 8 == 0 and block_rows > 0
    M = two_m // 2
    n_pairs = B * M
    n_flat = 2 * n_pairs

    # Targets interleaved to y_pred's native [u0, l0, u1, l1, ...] column
    # order: each target value duplicated into both lanes of its pair.
    # TODO(synk): expand targets in-kernel (pair-granularity tiles + XLU lane
    # interleave) to halve the target HBM read traffic, esp. for M_t == 1.
    yt = jnp.broadcast_to(y_true, (B, M))
    yt_int = jnp.stack([yt, yt], axis=-1).reshape(B, two_m)

    rows = -(-n_flat // _LANES)                  # ceil(n_flat / 128)
    rows = ((rows + 7) // 8) * 8                 # sublane-align row count
    if rows <= block_rows:
        tr = rows                                # single grid step
        rows_pad = rows
    else:
        tr = block_rows
        rows_pad = ((rows + tr - 1) // tr) * tr  # grid divides exactly
    n_flat_pad = rows_pad * _LANES
    pad_pairs = (n_flat_pad - n_flat) // 2

    # Free contiguous reshape; pad only when the flat length is unaligned.
    yp_flat = y_pred.reshape(n_flat)
    yt_flat = yt_int.reshape(n_flat)
    if n_flat_pad != n_flat:
        yp_flat = jnp.pad(yp_flat, (0, n_flat_pad - n_flat))
        yt_flat = jnp.pad(yt_flat, (0, n_flat_pad - n_flat))
    yp2 = yp_flat.reshape(rows_pad, _LANES)      # (rows_pad, 128)
    yt2 = yt_flat.reshape(rows_pad, _LANES)      # (rows_pad, 128)

    kernel = functools.partial(
        _qd_kernel,
        lambda_=float(lambda_),
        alpha_=float(alpha_),
        soften_=float(soften_),
        batch_size=float(batch_size),
        n_pairs=int(n_pairs),
        pad_pairs=int(pad_pairs),
    )

    grid = (rows_pad // tr,)
    out = pl.pallas_call(
        kernel,
        out_shape=jax.ShapeDtypeStruct((1, 1), jnp.float32),
        grid_spec=pltpu.PrefetchScalarGridSpec(
            num_scalar_prefetch=0,
            grid=grid,
            in_specs=[
                pl.BlockSpec((tr, _LANES), lambda i: (i, 0)),
                pl.BlockSpec((tr, _LANES), lambda i: (i, 0)),
            ],
            out_specs=pl.BlockSpec((1, 1), lambda i: (0, 0)),
            scratch_shapes=[pltpu.VMEM((3, 8, _LANES), jnp.float32)],
        ),
        compiler_params=pltpu.CompilerParams(
            dimension_semantics=("arbitrary",),   # reduction axis (accumulator)
            vmem_limit_bytes=32 * 1024 * 1024,    # safe on v5e/v6e/v7x
        ),
        # TODO(synk): v7x 2-TensorCore split (leading "parallel" grid axis of
        # size 2 producing per-core partial sums combined in the wrapper).
    )(yp2, yt2)
    return out.reshape((1,))


def _qd_reference(y_pred, y_true, *, lambda_=0.001, alpha_=0.05,
                  soften_=160.0, batch_size=128):
    """Pure-JAX reference (mirrors the PyTorch code)."""
    y_u = y_pred[:, ::2].astype(jnp.float32)
    y_l = y_pred[:, 1::2].astype(jnp.float32)
    y_t = y_true.astype(jnp.float32)
    k_hu = jnp.maximum(0.0, jnp.sign(y_u - y_t))
    k_hl = jnp.maximum(0.0, jnp.sign(y_t - y_l))
    k_h = k_hu * k_hl
    k_su = jax.nn.sigmoid(soften_ * (y_u - y_t))
    k_sl = jax.nn.sigmoid(soften_ * (y_t - y_l))
    k_s = k_su * k_sl
    picp_s = jnp.mean(k_s)
    mpiw_c = jnp.sum((y_u - y_l) * k_h) / (jnp.sum(k_h) + _F32_EPS)
    mle_picp = batch_size / (alpha_ * (1 - alpha_)) * jnp.square(
        jnp.maximum(0.0, 1 - alpha_ - picp_s))
    return jnp.reshape(mpiw_c + lambda_ * mle_picp, (1,))


if __name__ == "__main__":
    key = jax.random.PRNGKey(0)

    # Covers: tiny padded case, broadcast y_true (M_t = 1), multi-step grid
    # accumulation, and multi-step + ragged-tail bias correction combined.
    cases = [
        dict(B=8, M=1, Mt=1, block_rows=2048),
        dict(B=64, M=4, Mt=1, block_rows=2048),
        dict(B=256, M=8, Mt=8, block_rows=8),
        dict(B=96, M=11, Mt=11, block_rows=8),
    ]

    for c in cases:
        key, k1, k2, k3 = jax.random.split(key, 4)
        B, M, Mt = c["B"], c["M"], c["Mt"]

        y_true = jax.random.normal(k1, (B, Mt), dtype=jnp.float32)
        noise_u = jax.random.uniform(k2, (B, M), dtype=jnp.float32)
        noise_l = jax.random.uniform(k3, (B, M), dtype=jnp.float32)
        y_u = y_true + noise_u                     # mostly above target
        y_l = y_true - noise_l                     # mostly below target
        # Interleave: even columns = upper bounds, odd columns = lower bounds.
        y_pred = jnp.stack([y_u, y_l], axis=-1).reshape(B, 2 * M)

        params = dict(lambda_=0.001, alpha_=0.05, soften_=160.0, batch_size=B)

        loss = qd_objective(y_pred, y_true, block_rows=c["block_rows"],
                            **params)
        loss = jax.block_until_ready(loss)

        ref = _qd_reference(y_pred, y_true, **params)
        np.testing.assert_allclose(np.asarray(loss), np.asarray(ref),
                                   rtol=1e-4, atol=1e-5)

    print("KERNEL_OK")
</pallas_src>

<mosaic_0001>
module attributes {stable_mosaic.version = 11 : i64} {
  func.func @_qd_kernel(%arg0: i32, %arg1: memref<8x128xf32, #tpu.memory_space<vmem>>, %arg2: memref<8x128xf32, #tpu.memory_space<vmem>>, %arg3: memref<1x1xf32, #tpu.memory_space<vmem>>, %arg4: memref<3x8x128xf32, #tpu.memory_space<vmem>>) attributes {dimension_semantics = [#tpu.dimension_semantics<arbitrary>], iteration_bounds = array<i64: 1>, scalar_prefetch = 0 : i64, scratch_operands = 1 : i64, tpu.core_type = #tpu.core_type<tc>, window_params = [{transform_indices = @transform_0, window_bounds = array<i64: 8, 128>}, {transform_indices = @transform_1, window_bounds = array<i64: 8, 128>}, {pipeline_mode = #tpu.pipeline_mode<synchronous>, transform_indices = @transform_2, window_bounds = array<i64: 1, 1>}]} {
    %c0_i32 = arith.constant 0 : i32
    %0 = arith.cmpi eq, %arg0, %c0_i32 : i32
    %1 = arith.extui %0 : i1 to i32
    %c0_i32_0 = arith.constant 0 : i32
    %2 = arith.cmpi ne, %1, %c0_i32_0 : i32
    scf.if %2 {
      %cst_34 = arith.constant 0.000000e+00 : f32
      %63 = vector.broadcast %cst_34 : f32 to vector<3x8x128xf32>
      %c0_35 = arith.constant 0 : index
      %c0_36 = arith.constant 0 : index
      %c0_37 = arith.constant 0 : index
      %64 = vector.load %arg4[%c0_35, %c0_36, %c0_37] : memref<3x8x128xf32, #tpu.memory_space<vmem>>, vector<3x8x128xf32>
      tpu.vector_store %arg4[%c0_35, %c0_36, %c0_37], %63 {strides = array<i32>} : memref<3x8x128xf32, #tpu.memory_space<vmem>>, vector<3x8x128xf32>,
    } else {
    }
    %c0 = arith.constant 0 : index
    %c0_1 = arith.constant 0 : index
    %3 = vector.load %arg1[%c0, %c0_1] : memref<8x128xf32, #tpu.memory_space<vmem>>, vector<8x128xf32>
    %c0_2 = arith.constant 0 : index
    %c0_3 = arith.constant 0 : index
    %4 = vector.load %arg2[%c0_2, %c0_3] : memref<8x128xf32, #tpu.memory_space<vmem>>, vector<8x128xf32>
    %5 = tpu.iota {dimensions = array<i32: 1>} : vector<1x128xi32>
    %c1_i32 = arith.constant 1 : i32
    %6 = vector.broadcast %c1_i32 : i32 to vector<1x128xi32>
    %7 = arith.andi %5, %6 : vector<1x128xi32>
    %c0_i32_4 = arith.constant 0 : i32
    %8 = vector.broadcast %c0_i32_4 : i32 to vector<1x128xi32>
    %9 = arith.cmpi eq, %7, %8 : vector<1x128xi32>
    %cst = arith.constant 1.000000e+00 : f32
    %cst_5 = arith.constant -1.000000e+00 : f32
    %10 = vector.broadcast %cst : f32 to vector<1x128xf32>
    %11 = vector.broadcast %cst_5 : f32 to vector<1x128xf32>
    %12 = arith.select %9, %10, %11 : vector<1x128xi1>, vector<1x128xf32>
    %13 = arith.subf %3, %4 : vector<8x128xf32>
    %14 = vector.broadcast %12 : vector<1x128xf32> to vector<8x128xf32>
    %15 = arith.mulf %13, %14 : vector<8x128xf32>
    %cst_6 = arith.constant 1.600000e+02 : f32
    %16 = vector.broadcast %cst_6 : f32 to vector<8x128xf32>
    %17 = arith.mulf %16, %15 : vector<8x128xf32>
    %18 = arith.negf %17 : vector<8x128xf32>
    %19 = math.exp %18 : vector<8x128xf32>
    %cst_7 = arith.constant 1.000000e+00 : f32
    %20 = vector.broadcast %cst_7 : f32 to vector<8x128xf32>
    %21 = arith.addf %20, %19 : vector<8x128xf32>
    %22 = arith.divf %20, %21 : vector<8x128xf32>
    %c1_i32_8 = arith.constant 1 : i32
    %23 = tpu.dynamic_rotate %15 by %c1_i32_8 dim 1 : vector<8x128xf32>, i32 -> vector<8x128xf32>
    %c1_i32_9 = arith.constant 1 : i32
    %24 = tpu.dynamic_rotate %22 by %c1_i32_9 dim 1 : vector<8x128xf32>, i32 -> vector<8x128xf32>
    %25 = arith.mulf %22, %24 : vector<8x128xf32>
    %cst_10 = arith.constant 0.000000e+00 : f32
    %26 = vector.broadcast %cst_10 : f32 to vector<8x128xf32>
    %27 = arith.cmpf ogt, %15, %26 : vector<8x128xf32>
    %cst_11 = arith.constant 0.000000e+00 : f32
    %28 = vector.broadcast %cst_11 : f32 to vector<8x128xf32>
    %29 = arith.cmpf ogt, %23, %28 : vector<8x128xf32>
    %30 = arith.andi %27, %29 : vector<8x128xi1>
    %31 = arith.extui %30 : vector<8x128xi1> to vector<8x128xi32>
    %32 = arith.sitofp %31 : vector<8x128xi32> to vector<8x128xf32>
    %33 = arith.addf %15, %23 : vector<8x128xf32>
    %cst_12 = arith.constant 0.000000e+00 : f32
    %34 = vector.broadcast %cst_12 : f32 to vector<8x128xf32>
    %35 = arith.select %30, %33, %34 : vector<8x128xi1>, vector<8x128xf32>
    %c0_13 = arith.constant 0 : index
    %c0_14 = arith.constant 0 : index
    %c0_15 = arith.constant 0 : index
    %36 = vector.load %arg4[%c0_13, %c0_14, %c0_15] : memref<3x8x128xf32, #tpu.memory_space<vmem>>, vector<1x8x128xf32>
    %37 = vector.shape_cast %36 : vector<1x8x128xf32> to vector<8x128xf32>
    %38 = vector.shape_cast %25 : vector<8x128xf32> to vector<1x8x128xf32>
    %cst_16 = arith.constant dense<0.000000e+00> : vector<8x128xf32>
    %39 = vector.multi_reduction <add>, %38, %cst_16 [0] : vector<1x8x128xf32> to vector<8x128xf32>
    %40 = arith.addf %37, %39 : vector<8x128xf32>
    %c0_17 = arith.constant 0 : index
    %c0_18 = arith.constant 0 : index
    %c0_19 = arith.constant 0 : index
    %41 = vector.load %arg4[%c0_17, %c0_18, %c0_19] : memref<3x8x128xf32, #tpu.memory_space<vmem>>, vector<1x8x128xf32>
    %42 = vector.shape_cast %41 : vector<1x8x128xf32> to vector<8x128xf32>
    %43 = vector.shape_cast %40 : vector<8x128xf32> to vector<1x8x128xf32>
    tpu.vector_store %arg4[%c0_17, %c0_18, %c0_19], %43 {strides = array<i32>} : memref<3x8x128xf32, #tpu.memory_space<vmem>>, vector<1x8x128xf32>,
    %c1 = arith.constant 1 : index
    %c0_20 = arith.constant 0 : index
    %c0_21 = arith.constant 0 : index
    %44 = vector.load %arg4[%c1, %c0_20, %c0_21] : memref<3x8x128xf32, #tpu.memory_space<vmem>>, vector<1x8x128xf32>
    %45 = vector.shape_cast %44 : vector<1x8x128xf32> to vector<8x128xf32>
    %46 = vector.shape_cast %32 : vector<8x128xf32> to vector<1x8x128xf32>
    %cst_22 = arith.constant dense<0.000000e+00> : vector<8x128xf32>
    %47 = vector.multi_reduction <add>, %46, %cst_22 [0] : vector<1x8x128xf32> to vector<8x128xf32>
    %48 = arith.addf %45, %47 : vector<8x128xf32>
    %c1_23 = arith.constant 1 : index
    %c0_24 = arith.constant 0 : index
    %c0_25 = arith.constant 0 : index
    %49 = vector.load %arg4[%c1_23, %c0_24, %c0_25] : memref<3x8x128xf32, #tpu.memory_space<vmem>>, vector<1x8x128xf32>
    %50 = vector.shape_cast %49 : vector<1x8x128xf32> to vector<8x128xf32>
    %51 = vector.shape_cast %48 : vector<8x128xf32> to vector<1x8x128xf32>
    tpu.vector_store %arg4[%c1_23, %c0_24, %c0_25], %51 {strides = array<i32>} : memref<3x8x128xf32, #tpu.memory_space<vmem>>, vector<1x8x128xf32>,
    %c2 = arith.constant 2 : index
    %c0_26 = arith.constant 0 : index
    %c0_27 = arith.constant 0 : index
    %52 = vector.load %arg4[%c2, %c0_26, %c0_27] : memref<3x8x128xf32, #tpu.memory_space<vmem>>, vector<1x8x128xf32>
    %53 = vector.shape_cast %52 : vector<1x8x128xf32> to vector<8x128xf32>
    %54 = vector.shape_cast %35 : vector<8x128xf32> to vector<1x8x128xf32>
    %cst_28 = arith.constant dense<0.000000e+00> : vector<8x128xf32>
    %55 = vector.multi_reduction <add>, %54, %cst_28 [0] : vector<1x8x128xf32> to vector<8x128xf32>
    %56 = arith.addf %53, %55 : vector<8x128xf32>
    %c2_29 = arith.constant 2 : index
    %c0_30 = arith.constant 0 : index
    %c0_31 = arith.constant 0 : index
    %57 = vector.load %arg4[%c2_29, %c0_30, %c0_31] : memref<3x8x128xf32, #tpu.memory_space<vmem>>, vector<1x8x128xf32>
    %58 = vector.shape_cast %57 : vector<1x8x128xf32> to vector<8x128xf32>
    %59 = vector.shape_cast %56 : vector<8x128xf32> to vector<1x8x128xf32>
    tpu.vector_store %arg4[%c2_29, %c0_30, %c0_31], %59 {strides = array<i32>} : memref<3x8x128xf32, #tpu.memory_space<vmem>>, vector<1x8x128xf32>,
    %c0_i32_32 = arith.constant 0 : i32
    %60 = arith.cmpi eq, %arg0, %c0_i32_32 : i32
    %61 = arith.extui %60 : i1 to i32
    %c0_i32_33 = arith.constant 0 : i32
    %62 = arith.cmpi ne, %61, %c0_i32_33 : i32
    scf.if %62 {
      %63 = tpu.iota {dimensions = array<i32: 1>} : vector<8x128xi32>
      %c1_i32_34 = arith.constant 1 : i32
      %64 = vector.broadcast %c1_i32_34 : i32 to vector<8x128xi32>
      %65 = arith.andi %63, %64 : vector<8x128xi32>
      %c1_i32_35 = arith.constant 1 : i32
      %66 = vector.broadcast %c1_i32_35 : i32 to vector<8x128xi32>
      %67 = arith.cmpi eq, %65, %66 : vector<8x128xi32>
      %c0_36 = arith.constant 0 : index
      %c0_37 = arith.constant 0 : index
      %c0_38 = arith.constant 0 : index
      %68 = vector.load %arg4[%c0_36, %c0_37, %c0_38] : memref<3x8x128xf32, #tpu.memory_space<vmem>>, vector<1x8x128xf32>
      %69 = vector.shape_cast %68 : vector<1x8x128xf32> to vector<8x128xf32>
      %cst_39 = arith.constant 0.000000e+00 : f32
      %70 = vector.broadcast %cst_39 : f32 to vector<8x128xf32>
      %71 = arith.select %67, %69, %70 : vector<8x128xi1>, vector<8x128xf32>
      %72 = vector.shape_cast %71 : vector<8x128xf32> to vector<1x8x128xf32>
      %cst_40 = arith.constant dense<0.000000e+00> : vector<1xf32>
      %73 = vector.multi_reduction <add>, %72, %cst_40 [1, 2] : vector<1x8x128xf32> to vector<1xf32>
      %74 = vector.shape_cast %73 : vector<1xf32> to vector<1x1x1xf32>
      %75 = vector.extract %74[0, 0, 0] : f32 from vector<1x1x1xf32>
      %c1_41 = arith.constant 1 : index
      %c0_42 = arith.constant 0 : index
      %c0_43 = arith.constant 0 : index
      %76 = vector.load %arg4[%c1_41, %c0_42, %c0_43] : memref<3x8x128xf32, #tpu.memory_space<vmem>>, vector<1x8x128xf32>
      %77 = vector.shape_cast %76 : vector<1x8x128xf32> to vector<8x128xf32>
      %cst_44 = arith.constant 0.000000e+00 : f32
      %78 = vector.broadcast %cst_44 : f32 to vector<8x128xf32>
      %79 = arith.select %67, %77, %78 : vector<8x128xi1>, vector<8x128xf32>
      %80 = vector.shape_cast %79 : vector<8x128xf32> to vector<1x8x128xf32>
      %cst_45 = arith.constant dense<0.000000e+00> : vector<1xf32>
      %81 = vector.multi_reduction <add>, %80, %cst_45 [1, 2] : vector<1x8x128xf32> to vector<1xf32>
      %82 = vector.shape_cast %81 : vector<1xf32> to vector<1x1x1xf32>
      %83 = vector.extract %82[0, 0, 0] : f32 from vector<1x1x1xf32>
      %c2_46 = arith.constant 2 : index
      %c0_47 = arith.constant 0 : index
      %c0_48 = arith.constant 0 : index
      %84 = vector.load %arg4[%c2_46, %c0_47, %c0_48] : memref<3x8x128xf32, #tpu.memory_space<vmem>>, vector<1x8x128xf32>
      %85 = vector.shape_cast %84 : vector<1x8x128xf32> to vector<8x128xf32>
      %cst_49 = arith.constant 0.000000e+00 : f32
      %86 = vector.broadcast %cst_49 : f32 to vector<8x128xf32>
      %87 = arith.select %67, %85, %86 : vector<8x128xi1>, vector<8x128xf32>
      %88 = vector.shape_cast %87 : vector<8x128xf32> to vector<1x8x128xf32>
      %cst_50 = arith.constant dense<0.000000e+00> : vector<1xf32>
      %89 = vector.multi_reduction <add>, %88, %cst_50 [1, 2] : vector<1x8x128xf32> to vector<1xf32>
      %90 = vector.shape_cast %89 : vector<1xf32> to vector<1x1x1xf32>
      %91 = vector.extract %90[0, 0, 0] : f32 from vector<1x1x1xf32>
      %cst_51 = arith.constant 2.500000e-01 : f32
      %cst_52 = arith.constant 5.040000e+02 : f32
      %92 = arith.mulf %cst_51, %cst_52 : f32
      %93 = arith.subf %75, %92 : f32
      %cst_53 = arith.constant 8.000000e+00 : f32
      %94 = arith.divf %93, %cst_53 : f32
      %cst_54 = arith.constant 1.1920929E-7 : f32
      %95 = arith.addf %83, %cst_54 : f32
      %96 = arith.divf %91, %95 : f32
      %cst_55 = arith.constant 0.949999988 : f32
      %97 = arith.subf %cst_55, %94 : f32
      %cst_56 = arith.constant 0.000000e+00 : f32
      %98 = arith.maximumf %cst_56, %97 : f32
      %99 = arith.mulf %98, %98 : f32
      %cst_57 = arith.constant 168.421051 : f32
      %100 = arith.mulf %cst_57, %99 : f32
      %cst_58 = arith.constant 1.000000e-03 : f32
      %101 = arith.mulf %cst_58, %100 : f32
      %102 = arith.addf %96, %101 : f32
      %103 = vector.broadcast %102 : f32 to vector<1x1xf32>
      %c0_59 = arith.constant 0 : index
      %c0_60 = arith.constant 0 : index
      %104 = vector.load %arg3[%c0_59, %c0_60] : memref<1x1xf32, #tpu.memory_space<vmem>>, vector<1x1xf32>
      tpu.vector_store %arg3[%c0_59, %c0_60], %103 {strides = array<i32>} : memref<1x1xf32, #tpu.memory_space<vmem>>, vector<1x1xf32>,
    } else {
    }
    return
  }
  func.func @transform_0(%arg0: i32) -> (i32, i32) {
    %c0_i32 = arith.constant 0 : i32
    %c0_i32_0 = arith.constant 0 : i32
    return %arg0, %c0_i32 : i32, i32
  }
  func.func @transform_1(%arg0: i32) -> (i32, i32) {
    %c0_i32 = arith.constant 0 : i32
    %c0_i32_0 = arith.constant 0 : i32
    return %arg0, %c0_i32 : i32, i32
  }
  func.func @transform_2(%arg0: i32) -> (i32, i32) {
    %c0_i32 = arith.constant 0 : i32
    %c0_i32_0 = arith.constant 0 : i32
    %c0_i32_1 = arith.constant 0 : i32
    return %c0_i32, %c0_i32_0 : i32, i32
  }
}

</mosaic_0001>

<bundles_post_ra>
// kernel: tpu_custom_call.1
= control target key start
LH: loop header
LB: loop body
LE: loop exit
PB: predicated region body
PF: predicated region fallthrough
CT: control target
= control target key end

     0   :  { %7 = vsyncpa [#allocation4], 0  ;;  %s277_s0 = inlined_call_operand.hbm [shape: f32[8,128], index: 0, kind: input, shape index: {}]   ;;  %s278_s1 = inlined_call_operand.hbm [shape: f32[8,128], index: 1, kind: input, shape index: {}]   ;;  %s279_s2 = inlined_call_operand.hbm [shape: f32[1,1], index: 2, kind: output, shape index: {}]  }
   0x1   :  { %8 = vsyncpa [#allocation7], 0 }
   0x2   :  { %9 = vsyncpa [#allocation5], 0  ;;  %s246_s9 = smov [#allocation3]   ;;  %s247_s11 = smov [#allocation6]  }
   0x3   :  { %s16_s10 = sshll.u32 %s246_s9, 4  ;;  %s26_s12 = sshll.u32 %s247_s11, 4  ;;  %s17_s10 = int_to_ptr.vmem [resolvable:$true] %s16_s10  ;;  %s27_s12 = int_to_ptr.vmem [resolvable:$true] %s26_s12 }
   0x4   :  { %s188_s13 = scalar_lea.vmem %s17_s10, 128  ;;  %p193_p1 = scmp.lt.s32.totalorder %s17_s10, %s17_s10 }
   0x5   :  { %p189_p0 = scmp.ne.s32.totalorder %s17_s10, %s188_s13  ;;  %p194_p2 = scmp.lt.s32.totalorder %s188_s13, %s188_s13 }
   0x7   :  { %p195_p3 = por %p194_p2, %p193_p1 }
   0x9   :  { %p196_p4 = pnand %p195_p3, %p189_p0 }
   0xb   :  { %199 = shalt.err (!%p196_p4)
}
   0xc   :  { %19 = dma.hbm_to_vmem [thread:$0]  %s277_s0, 128, %s17_s10, [#allocation4]  }
   0xd   :  { %s208_s16 = scalar_lea.vmem %s27_s12, 128  ;;  %p213_p6 = scmp.lt.s32.totalorder %s27_s12, %s27_s12 }
   0xe   :  { %p209_p5 = scmp.ne.s32.totalorder %s27_s12, %s208_s16  ;;  %p214_p7 = scmp.lt.s32.totalorder %s208_s16, %s208_s16 }
  0x10   :  { %p215_p8 = por %p214_p7, %p213_p6 }
  0x12   :  { %p216_p9 = pnand %p215_p8, %p209_p5 }
  0x14   :  { %219 = shalt.err (!%p216_p9)
}
  0x15   :  { %29 = dma.hbm_to_vmem [thread:$0]  %s278_s1, 128, %s27_s12, [#allocation7]  }
  0x16   :  { %240 = dma.done.wait [#allocation4], 128  }
  0x17   :  { %241 = vsyncadd [#allocation4], 4294967168 }
  0x18   :  { %242 = dma.done.wait [#allocation7], 128  }
  0x19   :  { %243 = vsyncadd [#allocation7], 4294967168  ;;  %v45_v0 = vlaneseq  ;;  %v43_v3 = vld [vmem:[#allocation3] sm:$0xff]  ;;  %v44_v4 = vld [vmem:[#allocation6] sm:$0xff]  ;;  %v248_v5 = vmov -1.0   ;;  %s249_s0 = smov 1  }
  0x1a   :  { %v50_v7 = vsub.f32 %v43_v3, %v44_v4  ;;  %v250_v21 = vmov 0.0   ;;  %s251_s24 = smov 0.0   ;;  %s252_s4 = smov [#allocation8]   ;;  %vm138_vm5 = vcmask 0  }
  0x1b   :  { %v46_v1 = vand.u32 127, %v45_v0  ;;  %s146_s5 = sshll.u32 %s252_s4, 4  ;;  %s147_s5 = int_to_ptr.vmem [resolvable:$true] %s146_s5 }
  0x1c   :  { %s220_s7 = scalar_lea.vmem %s147_s5, 16  ;;  %s224_s8 = scalar_lea.vmem %s147_s5, 32 }
  0x1d   :  { %v47_v2 = vand.u32 1, %v46_v1  ;;  %p221_p10 = scmp.ne.s32.totalorder %s147_s5, %s220_s7  ;;  %p225_p11 = scmp.lt.s32.totalorder %s147_s5, %s147_s5 }
  0x1e   :  { %p226_p12 = scmp.lt.s32.totalorder %s224_s8, %s220_s7 }
  0x1f   :  { %vm48_vm0 = vcmp.eq.s32.totalorder %v47_v2, 0  ;;  %vm88_vm3 = vcmp.eq.s32.totalorder %v47_v2, 1 }
  0x20   :  { %v49_v6 = vsel %vm48_vm0, 1.0, %v248_v5  ;;  %p227_p13 = por %p226_p12, %p225_p11 }
  0x21   :  { %v51_v8 = vmul.f32 %v50_v7, %v49_v6 }
  0x22   :  { %p228_p0 = pnand %p227_p13, %p221_p10 }
  0x23   :  { %59 = vrot.lane.b32.xlu0 %v51_v8, %s249_s0  ;;  %v156_v9 = vmul.f32 -160.0, %v51_v8  ;;  %vm64_vm1 = vcmp.gt.f32.partialorder %v51_v8, 0.0 }
  0x25   :  { %v54_v10 = vmul.f32 1.442695, %v156_v9 }
  0x27   :  { %174 = vpow2.f32 %v54_v10 }
  0x34   :  { %v175_v11 = vpop.eup %174 }
  0x35   :  { %v56_v12 = vadd.f32 1.0, %v175_v11 }
  0x37   :  { %176 = vrcp.f32 %v56_v12 }
  0x44   :  { %v177_v13 = vpop.eup %176 }
  0x45   :  { %61 = vrot.lane.b32.xlu0 %v177_v13, %s249_s0 }
  0x95   :  { %v60_v14 = vpop.permute.xlu0 %59 }
  0x96   :  { %vm65_vm2 = vcmp.gt.f32.partialorder %v60_v14, 0.0  ;;  %v69_v15 = vadd.f32 %v60_v14, %v51_v8 }
  0x97   :  { %vm66_vm4 = vmand %vm64_vm1, %vm65_vm2 }
  0x98   :  { %v70_v16 = vsel %vm66_vm4, %v69_v15, 0.0  ;;  %v157_v22 = vsel %vm66_vm4, 1.0, %v250_v21 }
  0x99   :  { %v112_v17 = vsel %vm88_vm3, %v70_v16, 0.0  ;;  %v101_v23 = vsel %vm88_vm3, %v157_v22, 0.0 }
  0x9a   :  { %113 = vadd.xlane.f32.xlu0 %v112_v17 }
  0xb7   :  { %v62_v18 = vpop.permute.xlu0 %61 }
  0xb8   :  { %v63_v19 = vmul.f32 %v177_v13, %v62_v18 }
  0xba   :  { %v90_v20 = vsel %vm88_vm3, %v63_v19, 0.0 }
  0xbb   :  { %91 = vadd.xlane.f32.xlu1 %v90_v20 }
  0xbf   :  { %102 = vadd.xlane.f32.xlu1 %v101_v23 }
 0x123   :  { %v114_v24 = vpop.xlane.xlu0 %113 }
 0x124   :  { %v115_v25 = vrot.slane %v114_v24, 4 }
 0x126   :  { %v116_v26 = vadd.f32 %v115_v25, %v114_v24 }
 0x128   :  { %v117_v30 = vrot.slane %v116_v26, 2 }
 0x12a   :  { %v118_v36 = vadd.f32 %v117_v30, %v116_v26 }
 0x12c   :  { %v119_v41 = vrot.slane %v118_v36, 1 }
 0x12e   :  { %v120_v44 = vadd.f32 %v119_v41, %v118_v36 }
 0x144   :  { %v92_v27 = vpop.xlane.xlu1 %91 }
 0x145   :  { %v93_v28 = vrot.slane %v92_v27, 4 }
 0x147   :  { %v94_v29 = vadd.f32 %v93_v28, %v92_v27 }
 0x148   :  { %v103_v31 = vpop.xlane.xlu1 %102 }
 0x149   :  { %v95_v32 = vrot.slane %v94_v29, 2  ;;  %v104_v33 = vrot.slane %v103_v31, 4 }
 0x14b   :  { %v105_v34 = vadd.f32 %v104_v33, %v103_v31  ;;  %v96_v35 = vadd.f32 %v95_v32, %v94_v29 }
 0x14d   :  { %v106_v37 = vrot.slane %v105_v34, 2  ;;  %v97_v38 = vrot.slane %v96_v35, 1 }
 0x14f   :  { %v107_v39 = vadd.f32 %v106_v37, %v105_v34  ;;  %v98_v40 = vadd.f32 %v97_v38, %v96_v35 }
 0x151   :  { %159 = vpush %v98_v40  ;;  %v108_v42 = vrot.slane %v107_v39, 1 }
 0x153   :  { %v109_v43 = vadd.f32 %v108_v42, %v107_v39 }
 0x155   :  { %161 = vpush %v109_v43 }
 0x156   :  { %163 = vpush %v120_v44 }
 0x182   :  { %s160_s1 = spop %159 }
 0x183   :  { %s158_s21 = sadd.f32 -126.0, %s160_s1 }
 0x185   :  { %s125_s22 = smul.f32 0.125, %s158_s21 }
 0x186   :  { %s162_s19 = spop %161 }
 0x187   :  { %s126_s20 = sadd.f32 1.1920929e-07, %s162_s19  ;;  %s164_s28 = spop %163 }
 0x188   :  { %s131_s23 = ssub.f32 0.95, %s125_s22 }
 0x189   :  { %v127_v45 = vstv %s126_s20 }
 0x18a   :  { %178 = vrcp.f32 %v127_v45  ;;  %s132_s25 = smax.f32 %s251_s24, %s131_s23 }
 0x18b   :  { %s133_s26 = smul.f32 %s132_s25, %s132_s25 }
 0x18d   :  { %s134_s27 = smul.f32 168.42105, %s133_s26 }
 0x18f   :  { %s135_s30 = smul.f32 0.001, %s134_s27 }
 0x197   :  { %v179_v46 = vpop.eup %178 }
 0x198   :  { %165 = vpush %v179_v46 }
 0x1c9   :  { %s166_s29 = spop %165 }
 0x1ca   :  { %s130_s3 = smul.f32 %s166_s29, %s164_s28 }
 0x1cc   :  { %s136_s6 = sadd.f32 %s135_s30, %s130_s3 }
 0x1ce   :  { %v137_v47 = vstv %s136_s6 }
 0x1cf   :  { %139 = vst.msk [vmem:[#allocation8] sm:$0x1] %vm138_vm5, %v137_v47 }
 0x1d0   :  { %231 = shalt.err (!%p228_p0)
}
 0x1d1   :  { %149 = dma.vmem_to_hbm [thread:$0]  %s147_s5, 16, %s279_s2, [#allocation5]  }
 0x1d2   :  { %244 = dma.done.wait [#allocation5], 16  }
 0x1d3   :  { %245 = vsyncadd [#allocation5], 4294967280 }
 0x1d4   :  { %153 = vsyncpa [#allocation4], 1 }
 0x1d5   :  { %154 = vsyncpa [#allocation7], 1 }
 0x1d6   :  { %155 = vsyncpa [#allocation5], 1 }

</bundles_post_ra>
